<compile_context>
chip_gen: v7x
topology: tpu7x:2x2x1
jax: 0.10.0
libtpu: 0.0.40
codegen_flags: <defaults>
</compile_context>

<pallas_src>
import functools

import jax
import jax.numpy as jnp
from jax.experimental import pallas as pl
from jax.experimental.pallas import tpu as pltpu


# ---------------------------------------------------------------------------
# Fused Pallas kernel: whole FeatureEmbeddingLayer forward for one batch tile.
# ---------------------------------------------------------------------------
def _fused_feature_embedding_kernel(
    x_ref, w_ref, out_ref, *, non_embed_meta, embed_meta, v_total, e_total, plus_one
):
    """x_ref:   [TB, feature_dim] f32 (categorical cols hold integer-valued floats)
    w_ref:   [v_total, e_total + n_embed] bf16 fused block-diagonal table
             (+ one all-nonzero indicator column per embedded feature)
    out_ref: [TB, out_dim] f32 = concat(non-embed cols, pooled embeddings)."""
    x = x_ref[...]
    tb = x.shape[0]

    # 1) Pass-through (non-embedded) columns -> straight copy into output slab.
    for src, length, dst in non_embed_meta:
        out_ref[:, dst : dst + length] = x[:, src : src + length]

    # 2) Per-vocab multiplicity counts c[b, v]; V lives on the lane axis.
    #    No [B, L, E] intermediate, no 3-D iota, no reshape.
    iota_v = jax.lax.broadcasted_iota(jnp.int32, (tb, v_total), 1)
    counts = jnp.zeros((tb, v_total), jnp.float32)
    for src, num_slots, voff, _vocab, _eoff, _edim, _dst in embed_meta:
        tok = x[:, src : src + num_slots].astype(jnp.int32)
        if plus_one:  # oov_idx == -1 handling
            tok = tok + 1
        tok = tok + voff  # offset into this feature's vocab block
        for l in range(num_slots):
            counts = counts + (tok[:, l : l + 1] == iota_v).astype(jnp.float32)

    # 3) Single MXU matmul: pooled sums for every feature + all-nonzero counts.
    #    Counts are small integers (exact in bf16); accumulate in f32.
    res = jnp.dot(
        counts.astype(jnp.bfloat16), w_ref[...], preferred_element_type=jnp.float32
    )  # [TB, e_total + n_embed]

    # 4) Per-feature safe masked mean (same semantics as torch isclose/where/div:
    #    counts are exact integers so `== 0` is the isclose(cnt, 0, atol=1e-8) set).
    eps = jnp.float32(1e-8)
    for fi, (_src, _L, _voff, _vocab, eoff, edim, dst) in enumerate(embed_meta):
        sum_emb = res[:, eoff : eoff + edim]
        cnt = res[:, e_total + fi : e_total + fi + 1]
        safe = jnp.where(cnt == 0.0, eps, cnt)
        out_ref[:, dst : dst + edim] = sum_emb * pl.reciprocal(safe, approx=True)


# ---------------------------------------------------------------------------
# FeatureEmbeddingLayer (JAX/Pallas port)
# ---------------------------------------------------------------------------
class FeatureEmbeddingLayerPallas:
    """Synthetic-schema port of gigl FeatureEmbeddingLayer ('mean' aggregation).

    feature_slices: ordered dict feature_name -> (col_start, col_len)
    features_to_embed: dict feature_name -> emb_dim
    vocab_sizes: dict feature_name -> vocab size
    padding_idx: shared padding_idx (that table row is zeroed, as nn.Embedding does)
    oov_idx: if -1, a +1 shift is applied to tokens before lookup.
    """

    def __init__(
        self,
        feature_slices,
        features_to_embed,
        vocab_sizes,
        feature_dim,
        padding_idx=None,
        oov_idx=None,
        key=None,
        batch_tile=512,
    ):
        assert padding_idx is None or padding_idx >= 0
        assert oov_idx is None or oov_idx >= -1
        self.feature_slices = dict(feature_slices)
        self.features_to_embed = dict(features_to_embed)
        self.plus_one = oov_idx == -1
        self.batch_tile = batch_tile
        self.feature_dim = feature_dim
        self.all_features = list(feature_slices.keys())
        self.non_embed_features = [
            f for f in self.all_features if f not in self.features_to_embed
        ]

        if key is None:
            key = jax.random.PRNGKey(0)

        # Per-feature tables, stored at bf16 precision (MXU-native dtype).
        self.tables = {}
        for name, emb_dim in self.features_to_embed.items():
            vocab = vocab_sizes[name]
            key, sub = jax.random.split(key)
            w = jax.random.normal(sub, (vocab, emb_dim), dtype=jnp.float32)
            pad = padding_idx
            if self.plus_one and pad is not None:
                pad = pad + 1
            if pad is not None:
                w = w.at[pad].set(0.0)
            self.tables[name] = w.astype(jnp.bfloat16)

        # Static layout metadata: where each feature's columns come from / go to.
        dst = 0
        self.non_embed_meta = []
        for name in self.non_embed_features:
            s, l = self.feature_slices[name]
            self.non_embed_meta.append((s, l, dst))
            dst += l

        self.embed_meta = []
        voff = 0
        eoff = 0
        for name, emb_dim in self.features_to_embed.items():
            s, l = self.feature_slices[name]
            vocab = vocab_sizes[name]
            self.embed_meta.append((s, l, voff, vocab, eoff, emb_dim, dst))
            voff += vocab
            eoff += emb_dim
            dst += emb_dim
        self.v_total = voff
        self.e_total = eoff
        self.n_embed = len(self.embed_meta)
        self.out_dim = dst
        assert self.out_dim == feature_dim + sum(
            e - self.feature_slices[n][1] for n, e in self.features_to_embed.items()
        )

        # Fused block-diagonal table + per-feature all-nonzero indicator columns.
        w_big = jnp.zeros((self.v_total, self.e_total + self.n_embed), jnp.float32)
        for fi, (name, meta) in enumerate(zip(self.features_to_embed, self.embed_meta)):
            _src, _L, f_voff, vocab, f_eoff, edim, _dst = meta
            tab = self.tables[name].astype(jnp.float32)
            w_big = w_big.at[f_voff : f_voff + vocab, f_eoff : f_eoff + edim].set(tab)
            indicator = jnp.all(tab != 0.0, axis=1).astype(jnp.float32)
            w_big = w_big.at[f_voff : f_voff + vocab, self.e_total + fi].set(indicator)
        self.w_big = w_big.astype(jnp.bfloat16)

    # ---------------- Pallas forward ----------------
    def __call__(self, x: jax.Array) -> jax.Array:
        b, fdim = x.shape
        assert fdim == self.feature_dim

        # Batch tile: multiple of 8 sublanes, capped (fits v5e's scoped VMEM too).
        tb = min(self.batch_tile, max(8, -(-b // 8) * 8))
        tb = max(8, (tb // 8) * 8)
        bp = -(-b // tb) * tb
        if bp != b:
            x = jnp.pad(x, ((0, bp - b), (0, 0)))  # pad rows use token 0 (in-vocab)

        kernel = functools.partial(
            _fused_feature_embedding_kernel,
            non_embed_meta=tuple(self.non_embed_meta),
            embed_meta=tuple(self.embed_meta),
            v_total=self.v_total,
            e_total=self.e_total,
            plus_one=self.plus_one,
        )
        w_rows, w_cols = self.w_big.shape
        out = pl.pallas_call(
            kernel,
            out_shape=jax.ShapeDtypeStruct((bp, self.out_dim), jnp.float32),
            grid=(bp // tb,),
            in_specs=[
                pl.BlockSpec((tb, fdim), lambda i: (i, 0)),
                pl.BlockSpec((w_rows, w_cols), lambda i: (0, 0)),  # resident table
            ],
            out_specs=pl.BlockSpec((tb, self.out_dim), lambda i: (i, 0)),
            compiler_params=pltpu.CompilerParams(
                dimension_semantics=("parallel",),  # shards batch across v7x's 2 TCs
            ),
        )(x, self.w_big)
        return out[:b]

    # ---------------- Pure-JAX reference mirroring the PyTorch math ----------------
    def reference(self, x: jax.Array) -> jax.Array:
        parts = []
        for name in self.non_embed_features:
            s, l = self.feature_slices[name]
            parts.append(x[:, s : s + l])
        outs = [jnp.concatenate(parts, axis=1) if parts else x[:, :0]]
        for name in self.features_to_embed:
            s, l = self.feature_slices[name]
            tok = x[:, s : s + l].astype(jnp.int32)
            if self.plus_one:
                tok = tok + 1
            tab = self.tables[name].astype(jnp.float32)
            emb = tab[tok]  # [B, L, E]
            mask = jnp.all(emb != 0.0, axis=2)
            sum_emb = emb.sum(axis=1)
            cnt = mask.sum(axis=1, keepdims=True).astype(jnp.float32)
            eps = 1e-8
            safe = jnp.where(
                jnp.isclose(cnt, jnp.zeros_like(cnt), atol=eps),
                jnp.full_like(cnt, eps),
                cnt,
            )
            outs.append(sum_emb / safe)
        return jnp.concatenate(outs, axis=1)


# ---------------------------------------------------------------------------
if __name__ == "__main__":
    key = jax.random.PRNGKey(0)
    k_layer, k_x, k_tx, k_ty = jax.random.split(key, 4)

    # Synthetic schema (column slices of the flat [B, feature_dim] input):
    #   dense_a : 6 float dims (kept as-is)
    #   cat_x   : 8 token slots, vocab 32, emb_dim 16 (embedded)
    #   dense_b : 10 float dims (kept as-is)
    #   cat_y   : 4 token slots, vocab 16, emb_dim 8  (embedded)
    feature_slices = {
        "dense_a": (0, 6),
        "cat_x": (6, 8),
        "dense_b": (14, 10),
        "cat_y": (24, 4),
    }
    feature_dim = 28
    features_to_embed = {"cat_x": 16, "cat_y": 8}
    vocab_sizes = {"cat_x": 32, "cat_y": 16}
    padding_idx = 0

    layer = FeatureEmbeddingLayerPallas(
        feature_slices=feature_slices,
        features_to_embed=features_to_embed,
        vocab_sizes=vocab_sizes,
        feature_dim=feature_dim,
        padding_idx=padding_idx,
        oov_idx=None,
        key=k_layer,
    )

    B = 8
    x = jax.random.normal(k_x, (B, feature_dim), dtype=jnp.float32)
    tok_x = jax.random.randint(k_tx, (B, 8), 0, vocab_sizes["cat_x"])
    tok_y = jax.random.randint(k_ty, (B, 4), 0, vocab_sizes["cat_y"])
    tok_x = tok_x.at[:, -2:].set(padding_idx)  # some padded slots
    tok_y = tok_y.at[0, :].set(padding_idx)    # fully-padded row -> eps path
    x = x.at[:, 6:14].set(tok_x.astype(jnp.float32))
    x = x.at[:, 24:28].set(tok_y.astype(jnp.float32))

    out = jax.block_until_ready(layer(x))
    ref = layer.reference(x)

    assert out.shape == (B, layer.out_dim), (out.shape, layer.out_dim)
    # Tolerance accounts for the EUP approximate reciprocal (~1e-3 relative).
    assert jnp.allclose(out, ref, atol=1e-2, rtol=1e-2), "mismatch vs reference"

    print("KERNEL_OK")
</pallas_src>

<mosaic_0001>
module attributes {stable_mosaic.version = 11 : i64} {
  func.func @_fused_feature_embedding_kernel(%arg0: i32, %arg1: memref<8x28xf32, #tpu.memory_space<vmem>>, %arg2: memref<48x26xbf16, #tpu.memory_space<vmem>>, %arg3: memref<8x40xf32, #tpu.memory_space<vmem>>) attributes {dimension_semantics = [#tpu.dimension_semantics<parallel>], iteration_bounds = array<i64: 1>, scalar_prefetch = 0 : i64, scratch_operands = 0 : i64, tpu.core_type = #tpu.core_type<tc>, window_params = [{transform_indices = @transform_0, window_bounds = array<i64: 8, 28>}, {pipeline_mode = #tpu.pipeline_mode<synchronous>, transform_indices = @transform_1, window_bounds = array<i64: 48, 26>}, {transform_indices = @transform_2, window_bounds = array<i64: 8, 40>}]} {
    %c0 = arith.constant 0 : index
    %c0_0 = arith.constant 0 : index
    %0 = vector.load %arg1[%c0, %c0_0] : memref<8x28xf32, #tpu.memory_space<vmem>>, vector<8x28xf32>
    %1 = vector.extract_strided_slice %0 {offsets = [0, 0], sizes = [8, 6], strides = [1, 1]} : vector<8x28xf32> to vector<8x6xf32>
    %c0_1 = arith.constant 0 : index
    %c0_2 = arith.constant 0 : index
    %2 = vector.load %arg3[%c0_1, %c0_2] : memref<8x40xf32, #tpu.memory_space<vmem>>, vector<8x6xf32>
    tpu.vector_store %arg3[%c0_1, %c0_2], %1 {strides = array<i32>} : memref<8x40xf32, #tpu.memory_space<vmem>>, vector<8x6xf32>,
    %3 = vector.extract_strided_slice %0 {offsets = [0, 14], sizes = [8, 10], strides = [1, 1]} : vector<8x28xf32> to vector<8x10xf32>
    %c0_3 = arith.constant 0 : index
    %c6 = arith.constant 6 : index
    %4 = vector.load %arg3[%c0_3, %c6] : memref<8x40xf32, #tpu.memory_space<vmem>>, vector<8x10xf32>
    tpu.vector_store %arg3[%c0_3, %c6], %3 {strides = array<i32>} : memref<8x40xf32, #tpu.memory_space<vmem>>, vector<8x10xf32>,
    %5 = tpu.iota {dimensions = array<i32: 1>} : vector<8x48xi32>
    %cst = arith.constant 0.000000e+00 : f32
    %6 = vector.broadcast %cst : f32 to vector<8x48xf32>
    %7 = vector.extract_strided_slice %0 {offsets = [0, 6], sizes = [8, 8], strides = [1, 1]} : vector<8x28xf32> to vector<8x8xf32>
    %8 = arith.fptosi %7 : vector<8x8xf32> to vector<8x8xi32>
    %c0_i32 = arith.constant 0 : i32
    %9 = vector.broadcast %c0_i32 : i32 to vector<8x8xi32>
    %10 = arith.addi %8, %9 : vector<8x8xi32>
    %11 = vector.extract_strided_slice %10 {offsets = [0, 0], sizes = [8, 1], strides = [1, 1]} : vector<8x8xi32> to vector<8x1xi32>
    %12 = vector.broadcast %11 : vector<8x1xi32> to vector<8x48xi32>
    %13 = arith.cmpi eq, %12, %5 : vector<8x48xi32>
    %14 = arith.extui %13 : vector<8x48xi1> to vector<8x48xi32>
    %15 = arith.sitofp %14 : vector<8x48xi32> to vector<8x48xf32>
    %16 = arith.addf %6, %15 : vector<8x48xf32>
    %17 = vector.extract_strided_slice %10 {offsets = [0, 1], sizes = [8, 1], strides = [1, 1]} : vector<8x8xi32> to vector<8x1xi32>
    %18 = vector.broadcast %17 : vector<8x1xi32> to vector<8x48xi32>
    %19 = arith.cmpi eq, %18, %5 : vector<8x48xi32>
    %20 = arith.extui %19 : vector<8x48xi1> to vector<8x48xi32>
    %21 = arith.sitofp %20 : vector<8x48xi32> to vector<8x48xf32>
    %22 = arith.addf %16, %21 : vector<8x48xf32>
    %23 = vector.extract_strided_slice %10 {offsets = [0, 2], sizes = [8, 1], strides = [1, 1]} : vector<8x8xi32> to vector<8x1xi32>
    %24 = vector.broadcast %23 : vector<8x1xi32> to vector<8x48xi32>
    %25 = arith.cmpi eq, %24, %5 : vector<8x48xi32>
    %26 = arith.extui %25 : vector<8x48xi1> to vector<8x48xi32>
    %27 = arith.sitofp %26 : vector<8x48xi32> to vector<8x48xf32>
    %28 = arith.addf %22, %27 : vector<8x48xf32>
    %29 = vector.extract_strided_slice %10 {offsets = [0, 3], sizes = [8, 1], strides = [1, 1]} : vector<8x8xi32> to vector<8x1xi32>
    %30 = vector.broadcast %29 : vector<8x1xi32> to vector<8x48xi32>
    %31 = arith.cmpi eq, %30, %5 : vector<8x48xi32>
    %32 = arith.extui %31 : vector<8x48xi1> to vector<8x48xi32>
    %33 = arith.sitofp %32 : vector<8x48xi32> to vector<8x48xf32>
    %34 = arith.addf %28, %33 : vector<8x48xf32>
    %35 = vector.extract_strided_slice %10 {offsets = [0, 4], sizes = [8, 1], strides = [1, 1]} : vector<8x8xi32> to vector<8x1xi32>
    %36 = vector.broadcast %35 : vector<8x1xi32> to vector<8x48xi32>
    %37 = arith.cmpi eq, %36, %5 : vector<8x48xi32>
    %38 = arith.extui %37 : vector<8x48xi1> to vector<8x48xi32>
    %39 = arith.sitofp %38 : vector<8x48xi32> to vector<8x48xf32>
    %40 = arith.addf %34, %39 : vector<8x48xf32>
    %41 = vector.extract_strided_slice %10 {offsets = [0, 5], sizes = [8, 1], strides = [1, 1]} : vector<8x8xi32> to vector<8x1xi32>
    %42 = vector.broadcast %41 : vector<8x1xi32> to vector<8x48xi32>
    %43 = arith.cmpi eq, %42, %5 : vector<8x48xi32>
    %44 = arith.extui %43 : vector<8x48xi1> to vector<8x48xi32>
    %45 = arith.sitofp %44 : vector<8x48xi32> to vector<8x48xf32>
    %46 = arith.addf %40, %45 : vector<8x48xf32>
    %47 = vector.extract_strided_slice %10 {offsets = [0, 6], sizes = [8, 1], strides = [1, 1]} : vector<8x8xi32> to vector<8x1xi32>
    %48 = vector.broadcast %47 : vector<8x1xi32> to vector<8x48xi32>
    %49 = arith.cmpi eq, %48, %5 : vector<8x48xi32>
    %50 = arith.extui %49 : vector<8x48xi1> to vector<8x48xi32>
    %51 = arith.sitofp %50 : vector<8x48xi32> to vector<8x48xf32>
    %52 = arith.addf %46, %51 : vector<8x48xf32>
    %53 = vector.extract_strided_slice %10 {offsets = [0, 7], sizes = [8, 1], strides = [1, 1]} : vector<8x8xi32> to vector<8x1xi32>
    %54 = vector.broadcast %53 : vector<8x1xi32> to vector<8x48xi32>
    %55 = arith.cmpi eq, %54, %5 : vector<8x48xi32>
    %56 = arith.extui %55 : vector<8x48xi1> to vector<8x48xi32>
    %57 = arith.sitofp %56 : vector<8x48xi32> to vector<8x48xf32>
    %58 = arith.addf %52, %57 : vector<8x48xf32>
    %59 = vector.extract_strided_slice %0 {offsets = [0, 24], sizes = [8, 4], strides = [1, 1]} : vector<8x28xf32> to vector<8x4xf32>
    %60 = arith.fptosi %59 : vector<8x4xf32> to vector<8x4xi32>
    %c32_i32 = arith.constant 32 : i32
    %61 = vector.broadcast %c32_i32 : i32 to vector<8x4xi32>
    %62 = arith.addi %60, %61 : vector<8x4xi32>
    %63 = vector.extract_strided_slice %62 {offsets = [0, 0], sizes = [8, 1], strides = [1, 1]} : vector<8x4xi32> to vector<8x1xi32>
    %64 = vector.broadcast %63 : vector<8x1xi32> to vector<8x48xi32>
    %65 = arith.cmpi eq, %64, %5 : vector<8x48xi32>
    %66 = arith.extui %65 : vector<8x48xi1> to vector<8x48xi32>
    %67 = arith.sitofp %66 : vector<8x48xi32> to vector<8x48xf32>
    %68 = arith.addf %58, %67 : vector<8x48xf32>
    %69 = vector.extract_strided_slice %62 {offsets = [0, 1], sizes = [8, 1], strides = [1, 1]} : vector<8x4xi32> to vector<8x1xi32>
    %70 = vector.broadcast %69 : vector<8x1xi32> to vector<8x48xi32>
    %71 = arith.cmpi eq, %70, %5 : vector<8x48xi32>
    %72 = arith.extui %71 : vector<8x48xi1> to vector<8x48xi32>
    %73 = arith.sitofp %72 : vector<8x48xi32> to vector<8x48xf32>
    %74 = arith.addf %68, %73 : vector<8x48xf32>
    %75 = vector.extract_strided_slice %62 {offsets = [0, 2], sizes = [8, 1], strides = [1, 1]} : vector<8x4xi32> to vector<8x1xi32>
    %76 = vector.broadcast %75 : vector<8x1xi32> to vector<8x48xi32>
    %77 = arith.cmpi eq, %76, %5 : vector<8x48xi32>
    %78 = arith.extui %77 : vector<8x48xi1> to vector<8x48xi32>
    %79 = arith.sitofp %78 : vector<8x48xi32> to vector<8x48xf32>
    %80 = arith.addf %74, %79 : vector<8x48xf32>
    %81 = vector.extract_strided_slice %62 {offsets = [0, 3], sizes = [8, 1], strides = [1, 1]} : vector<8x4xi32> to vector<8x1xi32>
    %82 = vector.broadcast %81 : vector<8x1xi32> to vector<8x48xi32>
    %83 = arith.cmpi eq, %82, %5 : vector<8x48xi32>
    %84 = arith.extui %83 : vector<8x48xi1> to vector<8x48xi32>
    %85 = arith.sitofp %84 : vector<8x48xi32> to vector<8x48xf32>
    %86 = arith.addf %80, %85 : vector<8x48xf32>
    %87 = arith.truncf %86 : vector<8x48xf32> to vector<8x48xbf16>
    %c0_4 = arith.constant 0 : index
    %c0_5 = arith.constant 0 : index
    %88 = vector.load %arg2[%c0_4, %c0_5] : memref<48x26xbf16, #tpu.memory_space<vmem>>, vector<48x26xbf16>
    %cst_6 = arith.constant dense<0.000000e+00> : vector<8x26xf32>
    %89 = tpu.matmul %87, %88, %cst_6 {dimension_numbers = #tpu.dot_dimension_numbers<[1], [0], [0], [1], [0, 0, 1, 1], [], []>} : vector<8x48xbf16>, vector<48x26xbf16>, vector<8x26xf32> -> vector<8x26xf32>
    %90 = vector.extract_strided_slice %89 {offsets = [0, 0], sizes = [8, 16], strides = [1, 1]} : vector<8x26xf32> to vector<8x16xf32>
    %91 = vector.extract_strided_slice %89 {offsets = [0, 24], sizes = [8, 1], strides = [1, 1]} : vector<8x26xf32> to vector<8x1xf32>
    %cst_7 = arith.constant 0.000000e+00 : f32
    %92 = vector.broadcast %cst_7 : f32 to vector<8x1xf32>
    %93 = arith.cmpf oeq, %91, %92 : vector<8x1xf32>
    %cst_8 = arith.constant 9.99999993E-9 : f32
    %94 = vector.broadcast %cst_8 : f32 to vector<8x1xf32>
    %95 = arith.select %93, %94, %91 : vector<8x1xi1>, vector<8x1xf32>
    %96 = tpu.reciprocal %95 {approx = true} : vector<8x1xf32> -> vector<8x1xf32>
    %97 = vector.broadcast %96 : vector<8x1xf32> to vector<8x16xf32>
    %98 = arith.mulf %90, %97 : vector<8x16xf32>
    %c0_9 = arith.constant 0 : index
    %c16 = arith.constant 16 : index
    %99 = vector.load %arg3[%c0_9, %c16] : memref<8x40xf32, #tpu.memory_space<vmem>>, vector<8x16xf32>
    tpu.vector_store %arg3[%c0_9, %c16], %98 {strides = array<i32>} : memref<8x40xf32, #tpu.memory_space<vmem>>, vector<8x16xf32>,
    %100 = vector.extract_strided_slice %89 {offsets = [0, 16], sizes = [8, 8], strides = [1, 1]} : vector<8x26xf32> to vector<8x8xf32>
    %101 = vector.extract_strided_slice %89 {offsets = [0, 25], sizes = [8, 1], strides = [1, 1]} : vector<8x26xf32> to vector<8x1xf32>
    %cst_10 = arith.constant 0.000000e+00 : f32
    %102 = vector.broadcast %cst_10 : f32 to vector<8x1xf32>
    %103 = arith.cmpf oeq, %101, %102 : vector<8x1xf32>
    %cst_11 = arith.constant 9.99999993E-9 : f32
    %104 = vector.broadcast %cst_11 : f32 to vector<8x1xf32>
    %105 = arith.select %103, %104, %101 : vector<8x1xi1>, vector<8x1xf32>
    %106 = tpu.reciprocal %105 {approx = true} : vector<8x1xf32> -> vector<8x1xf32>
    %107 = vector.broadcast %106 : vector<8x1xf32> to vector<8x8xf32>
    %108 = arith.mulf %100, %107 : vector<8x8xf32>
    %c0_12 = arith.constant 0 : index
    %c32 = arith.constant 32 : index
    %109 = vector.load %arg3[%c0_12, %c32] : memref<8x40xf32, #tpu.memory_space<vmem>>, vector<8x8xf32>
    tpu.vector_store %arg3[%c0_12, %c32], %108 {strides = array<i32>} : memref<8x40xf32, #tpu.memory_space<vmem>>, vector<8x8xf32>,
    return
  }
  func.func @transform_0(%arg0: i32) -> (i32, i32) {
    %c0_i32 = arith.constant 0 : i32
    %c0_i32_0 = arith.constant 0 : i32
    return %arg0, %c0_i32 : i32, i32
  }
  func.func @transform_1(%arg0: i32) -> (i32, i32) {
    %c0_i32 = arith.constant 0 : i32
    %c0_i32_0 = arith.constant 0 : i32
    %c0_i32_1 = arith.constant 0 : i32
    return %c0_i32, %c0_i32_0 : i32, i32
  }
  func.func @transform_2(%arg0: i32) -> (i32, i32) {
    %c0_i32 = arith.constant 0 : i32
    %c0_i32_0 = arith.constant 0 : i32
    return %arg0, %c0_i32 : i32, i32
  }
}

</mosaic_0001>

<bundles_post_ra>
// kernel: tpu_custom_call.1
= control target key start
LH: loop header
LB: loop body
LE: loop exit
PB: predicated region body
PF: predicated region fallthrough
CT: control target
= control target key end

     0   :  { %v312_v1 = vmov 8   ;;  %v313_v2 = vmov 6   ;;  %v314_v5 = vmov 0.0   ;;  %s392_s0 = inlined_call_operand.vmem [shape: f32[8,28], index: 0, kind: input, shape index: {}]   ;;  %s393_s1 = inlined_call_operand.vmem [shape: bf16[48,26], index: 1, kind: input, shape index: {}]   ;;  %s394_s2 = inlined_call_operand.hbm [shape: f32[8,40], index: 2, kind: output, shape index: {}]  }
   0x1   :  { %v347_v0 = vld [vmem:[%s392_s0] sm:$0xff]  ;;  %270 = vset.pattern.permute.xlu1 %v312_v1  ;;  %268 = vset.pattern.permute.xlu0 %v313_v2 }
   0x2   :  { %v249_v3 = vtrunc.f32 %v347_v0  ;;  %239 = vmatprep.subr.bf16.mxu0 %v314_v5 }
   0x4   :  { %v250_v4 = vcvt.f32.s32 %v249_v3 }
   0x5   :  { %7 = vsyncpa [#allocation3], 0  ;;  %v315_v6 = vmov 9   ;;  %v316_v7 = vmov 7   ;;  %v317_v8 = vmov 10   ;;  %v318_v9 = vmov 11  }
   0x6   :  { %40 = vperm.xlu1 %270, %v250_v4   ;;  %26 = vperm.xlu0 %268, %v250_v4   ;;  %v81_v10 = vadd.s32 32, %v250_v4  ;;  %v319_v11 = vmov 12   ;;  %v320_v12 = vmov 24   ;;  %v321_v13 = vmov 13   ;;  %v283_v16 = vld [vmem:[%s393_s1] sm:$0xff]   ;;  %v284_v18 = vld [vmem:[%s393_s1 + $0x8] sm:$0xff]  }
   0x7   :  { %v322_v14 = vmov 27   ;;  %v323_v15 = vmov 25   ;;  %240 = vmatpush3.bf16.msra.mxu0 %v283_v16  ;;  %v324_v17 = vmov 26   ;;  %v285_v19 = vld [vmem:[%s393_s1 + $0x10] sm:$0xff]   ;;  %vm325_vm0 = vmmov 0   ;;  %s326_s1 = smov 120  }
   0x8   :  { %241 = vmatprep.subr.bf16.mxu0 %v314_v5  ;;  %245 = vmatprep.mubr.msk.bf16.mxu0 %vm325_vm0, %v314_v5  ;;  %v22_v20 = vlaneseq  ;;  %vm135_vm13 = vcmask 392192   ;;  %vm14_vm15 = vcmask 48128   ;;  %vm20_vm0 = vcmask 130096   ;;  %s327_s16 = smov 16   ;;  %s328_s17 = smov [#allocation2]  }
   0x9   :  { %15 = vst.msk [vmem:[#allocation2] sm:$0xff] %vm14_vm15, %v347_v0  ;;  %s211_s18 = sshll.u32 %s328_s17, 4  ;;  %s212_s18 = int_to_ptr.vmem [resolvable:$true] %s211_s18 }
   0xa   :  { %271 = vset.pattern.permute.xlu1 %v315_v6  ;;  %269 = vset.pattern.permute.xlu0 %v316_v7  ;;  %v23_v21 = vand.u32 127, %v22_v20  ;;  %s288_s19 = scalar_lea.vmem %s212_s18, 128  ;;  %p293_p1 = scmp.lt.s32.totalorder %s212_s18, %s212_s18 }
   0xb   :  { %47 = vperm.xlu1 %271, %v250_v4   ;;  %33 = vperm.xlu0 %269, %v250_v4   ;;  %p289_p0 = scmp.ne.s32.totalorder %s212_s18, %s288_s19  ;;  %p294_p2 = scmp.lt.s32.totalorder %s288_s19, %s288_s19 }
   0xc   :  { %242 = vmatpush3.bf16.msra.mxu0 %v284_v18 }
   0xd   :  { %243 = vmatprep.subr.bf16.mxu0 %v314_v5  ;;  %p295_p3 = por %p294_p2, %p293_p1 }
   0xf   :  { %272 = vset.pattern.permute.xlu1 %v317_v8  ;;  %273 = vset.pattern.permute.xlu0 %v318_v9  ;;  %p296_p4 = pnand %p295_p3, %p289_p0 }
  0x10   :  { %54 = vperm.xlu1 %272, %v250_v4   ;;  %61 = vperm.xlu0 %273, %v250_v4  }
  0x11   :  { %244 = vmatpush3.bf16.msra.mxu0 %v285_v19 }
  0x14   :  { %274 = vset.pattern.permute.xlu1 %v319_v11  ;;  %276 = vset.pattern.permute.xlu0 %v320_v12 }
  0x15   :  { %68 = vperm.xlu1 %274, %v250_v4   ;;  %83 = vperm.xlu0 %276, %v81_v10  }
  0x19   :  { %275 = vset.pattern.permute.xlu1 %v321_v13  ;;  %279 = vset.pattern.permute.xlu0 %v322_v14 }
  0x1a   :  { %75 = vperm.xlu1 %275, %v250_v4   ;;  %104 = vperm.xlu0 %279, %v81_v10  }
  0x1e   :  { %277 = vset.pattern.permute.xlu1 %v323_v15  ;;  %282 = vset.pattern.permute.xlu0 %v323_v15 }
  0x1f   :  { %90 = vperm.xlu1 %277, %v81_v10   ;;  %17 = vrot.lane.b32.xlu0 %v347_v0, %s326_s1 }
  0x23   :  { %278 = vset.pattern.permute.xlu1 %v324_v17 }
  0x24   :  { %97 = vperm.xlu1 %278, %v81_v10  }
  0x28   :  { %280 = vset.pattern.permute.xlu1 %v320_v12 }
  0x85   :  { %v41_v22 = vpop.permute.xlu1 %40  ;;  %v27_v23 = vpop.permute.xlu0 %26 }
  0x86   :  { %vm28_vm1 = vcmp.eq.s32.totalorder %v27_v23, %v23_v21  ;;  %vm42_vm2 = vcmp.eq.s32.totalorder %v41_v22, %v23_v21 }
  0x87   :  { %v219_v24 = vsel %vm28_vm1, 1.0, %v314_v5  ;;  %v221_v29 = vsel %vm42_vm2, 1.0, %v314_v5  ;;  %vm192_vm1 = vcmask 261248   ;;  %vm203_vm2 = vcmask 326912  }
  0x8a   :  { %v48_v25 = vpop.permute.xlu1 %47  ;;  %v34_v26 = vpop.permute.xlu0 %33 }
  0x8b   :  { %vm35_vm3 = vcmp.eq.s32.totalorder %v34_v26, %v23_v21  ;;  %vm49_vm4 = vcmp.eq.s32.totalorder %v48_v25, %v23_v21 }
  0x8c   :  { %v220_v27 = vsel %vm35_vm3, 1.0, %v314_v5  ;;  %v222_v33 = vsel %vm49_vm4, 1.0, %v314_v5 }
  0x8d   :  { %v38_v28 = vadd.f32 %v220_v27, %v219_v24 }
  0x8f   :  { %v45_v30 = vadd.f32 %v221_v29, %v38_v28  ;;  %v55_v31 = vpop.permute.xlu1 %54  ;;  %v62_v32 = vpop.permute.xlu0 %61 }
  0x90   :  { %vm56_vm5 = vcmp.eq.s32.totalorder %v55_v31, %v23_v21  ;;  %vm63_vm6 = vcmp.eq.s32.totalorder %v62_v32, %v23_v21 }
  0x91   :  { %v52_v34 = vadd.f32 %v222_v33, %v45_v30  ;;  %v223_v35 = vsel %vm56_vm5, 1.0, %v314_v5  ;;  %v224_v37 = vsel %vm63_vm6, 1.0, %v314_v5 }
  0x93   :  { %v59_v36 = vadd.f32 %v223_v35, %v52_v34 }
  0x94   :  { %v69_v38 = vpop.permute.xlu1 %68  ;;  %v84_v41 = vpop.permute.xlu0 %83 }
  0x95   :  { %vm70_vm7 = vcmp.eq.s32.totalorder %v69_v38, %v23_v21  ;;  %v66_v39 = vadd.f32 %v224_v37, %v59_v36  ;;  %vm85_vm9 = vcmp.eq.s32.totalorder %v84_v41, %v23_v21 }
  0x96   :  { %v225_v40 = vsel %vm70_vm7, 1.0, %v314_v5  ;;  %v227_v46 = vsel %vm85_vm9, 1.0, %v314_v5 }
  0x97   :  { %v73_v43 = vadd.f32 %v225_v40, %v66_v39 }
  0x99   :  { %v76_v42 = vpop.permute.xlu1 %75  ;;  %v105_v48 = vpop.permute.xlu0 %104 }
  0x9a   :  { %vm77_vm8 = vcmp.eq.s32.totalorder %v76_v42, %v23_v21  ;;  %vm106_vm11 = vcmp.eq.s32.totalorder %v105_v48, %v23_v21 }
  0x9b   :  { %v226_v44 = vsel %vm77_vm8, 1.0, %v314_v5  ;;  %v230_v54 = vsel %vm106_vm11, 1.0, %v314_v5 }
  0x9c   :  { %v80_v45 = vadd.f32 %v226_v44, %v73_v43 }
  0x9d   :  { %v18_v1 = vpop.permute.xlu0 %17 }
  0x9e   :  { %v91_v47 = vpop.permute.xlu1 %90  ;;  %v88_v49 = vadd.f32 %v227_v46, %v80_v45  ;;  %21 = vst.msk [vmem:[#allocation2] sm:$0xff] %vm20_vm0, %v18_v1 }
  0x9f   :  { %vm92_vm10 = vcmp.eq.s32.totalorder %v91_v47, %v23_v21 }
  0xa0   :  { %v228_v50 = vsel %vm92_vm10, 1.0, %v314_v5 }
  0xa1   :  { %v95_v52 = vadd.f32 %v228_v50, %v88_v49 }
  0xa3   :  { %v98_v51 = vpop.permute.xlu1 %97 }
  0xa4   :  { %vm99_vm12 = vcmp.eq.s32.totalorder %v98_v51, %v23_v21 }
  0xa5   :  { %v229_v53 = vsel %vm99_vm12, 1.0, %v314_v5 }
  0xa6   :  { %v102_v55 = vadd.f32 %v229_v53, %v95_v52 }
  0xa8   :  { %v109_v56 = vadd.f32 %v230_v54, %v102_v55 }
  0xaa   :  { %v110_v57 = vpack.c.bf16 %v109_v56, %v109_v56 }
  0xac   :  { %246 = vmatmul.mubr.msk.bf16.vlgmr.msra.gmra.mrb[0].mxu0 %vm135_vm13, %v110_v57 }
 0x17f   :  { %v173_v58 = vpop.f32.mrb[0].mxu0 }
 0x180   :  { %vm179_vm14 = vcmp.eq.f32.partialorder %v173_v58, 0.0  ;;  %v247_v59 = vpop.f32.mrb[1].mxu0 }
 0x181   :  { %v180_v60 = vsel %vm179_vm14, 1e-08, %v173_v58  ;;  %v176_v61 = vpop.f32.mrb[2].mxu0 }
 0x182   :  { %286 = vrcp.f32 %v180_v60  ;;  %v248_v62 = vpop.f32.mrb[3].mxu0 }
 0x18c   :  { %v287_v63 = vpop.eup %286 }
 0x18d   :  { %184 = vperm.xlu1 %280, %v287_v63  }
 0x191   :  { %281 = vset.pattern.permute.xlu1 %v323_v15 }
 0x192   :  { %195 = vperm.xlu1 %281, %v287_v63  }
 0x20c   :  { %v185_v2 = vpop.permute.xlu1 %184 }
 0x20d   :  { %v187_v3 = vmul.f32 %v185_v2, %v173_v58 }
 0x20f   :  { %189 = vrot.lane.b32.xlu1 %v187_v3, %s327_s16 }
 0x211   :  { %v196_v4 = vpop.permute.xlu1 %195 }
 0x212   :  { %v198_v5 = vmul.f32 %v196_v4, %v173_v58 }
 0x214   :  { %200 = vrot.lane.b32.xlu0 %v198_v5, %s327_s16 }
 0x281   :  { %v190_v6 = vpop.permute.xlu1 %189 }
 0x282   :  { %193 = vst.msk [vmem:[#allocation2] sm:$0xff] %vm192_vm1, %v190_v6 }
 0x286   :  { %v201_v7 = vpop.permute.xlu0 %200 }
 0x287   :  { %204 = vst.msk [vmem:[#allocation2] sm:$0xff] %vm203_vm2, %v201_v7 }
 0x288   :  { %299 = shalt.err (!%p296_p4)
}
 0x289   :  { %s300_s22 = scalar_lea.hbm %s394_s2, 128 }
 0x28a   :  { %p301_p5 = scmp.ne.s32.totalorder %s394_s2, %s300_s22  ;;  %p304_p6 = scmp.lt.u32.totalorder %s300_s22, %s394_s2 }
 0x28c   :  { %p306_p7 = pnand %p304_p6, %p301_p5 }
 0x28e   :  { %309 = shalt.err (!%p306_p7)
}
 0x28f   :  { %214 = dma.vmem_to_hbm [thread:$0]  %s212_s18, 128, %s394_s2, [#allocation3]  }
 0x290   :  { %310 = dma.done.wait [#allocation3], 128  }
 0x291   :  { %311 = vsyncadd [#allocation3], 4294967168 }
 0x292   :  { %218 = vsyncpa [#allocation3], 1 }

</bundles_post_ra>
